<compile_context>
chip_gen: v5e
topology: v5e:2x2
jax: 0.10.0
libtpu: 0.0.40
codegen_flags: <defaults>
</compile_context>

<pallas_src>
import functools

import jax
import jax.numpy as jnp
from jax.experimental import pallas as pl
from jax.experimental.pallas import tpu as pltpu

EPS = 1e-5


# ---------------------------------------------------------------------------
# In-kernel helpers
# ---------------------------------------------------------------------------
def _conv3x3_rows(xrows, t_ref, c):
    """3x3 'same' conv in lane-dense row layout.

    xrows: (H, W*Cin) activation rows for one sample (f32 value).
    t_ref: (3, (W+2)*Cin, W*Cout) block-Toeplitz weight ref (one slab per dy).
    Returns (H, W*Cout) f32 conv output.
    """
    h, wc = xrows.shape
    # Halo ring only: 2 zero rows (top/bottom) + C zero lanes (left/right).
    zc = jnp.zeros((h, c), jnp.float32)
    zr = jnp.zeros((1, wc + 2 * c), jnp.float32)
    xpad = jnp.concatenate(
        [zr, jnp.concatenate([zc, xrows, zc], axis=1), zr], axis=0)
    acc = jnp.dot(xpad[0:h, :], t_ref[0], preferred_element_type=jnp.float32)
    acc += jnp.dot(xpad[1:h + 1, :], t_ref[1], preferred_element_type=jnp.float32)
    acc += jnp.dot(xpad[2:h + 2, :], t_ref[2], preferred_element_type=jnp.float32)
    return acc


def _row_stats(y):
    """Single-pass per-lane sum and sum-of-squares -> (2, W*C)."""
    s = jnp.sum(y, axis=0, keepdims=True)
    ss = jnp.sum(y * y, axis=0, keepdims=True)
    return jnp.concatenate([s, ss], axis=0)


# ---------------------------------------------------------------------------
# Kernels (grid = (N,), one sample per step, 'parallel' semantics)
# ---------------------------------------------------------------------------
def conv1_kernel(x_ref, t1_ref, y1_ref, st1_ref, *, c):
    y = _conv3x3_rows(x_ref[0], t1_ref, c)
    y1_ref[0] = y
    st1_ref[0] = _row_stats(y)


def bn1_relu_conv2_kernel(y1_ref, sc1_ref, sh1_ref, t2_ref, y2_ref, st2_ref, *, c):
    a = jnp.maximum(y1_ref[0] * sc1_ref[...] + sh1_ref[...], 0.0)
    y = _conv3x3_rows(a, t2_ref, c)
    y2_ref[0] = y
    st2_ref[0] = _row_stats(y)


def bn2_add_relu_kernel(y2_ref, x_ref, sc2_ref, sh2_ref, out_ref):
    out_ref[0] = jnp.maximum(
        y2_ref[0] * sc2_ref[...] + sh2_ref[...] + x_ref[0], 0.0)


# ---------------------------------------------------------------------------
# Wrapper-side helpers (tiny XLA ops between the pallas_calls)
# ---------------------------------------------------------------------------
def _toeplitz_weights(w_oihw, width, cin, cout):
    """(Cout, Cin, 3, 3) PyTorch weight -> (3, (width+2)*Cin, width*Cout)."""
    wt = jnp.transpose(w_oihw, (2, 3, 1, 0)).astype(jnp.float32)  # (3,3,ci,co)
    p = jnp.arange(width + 2)[:, None]
    q = jnp.arange(width)[None, :]
    dx = p - q
    valid = (dx >= 0) & (dx <= 2)
    dxc = jnp.clip(dx, 0, 2)
    blocks = wt[:, dxc]                                  # (3, W+2, W, ci, co)
    blocks = jnp.where(valid[None, :, :, None, None], blocks, 0.0)
    return jnp.transpose(blocks, (0, 1, 3, 2, 4)).reshape(
        3, (width + 2) * cin, width * cout)


def _bn_scale_shift_rows(stats, gamma, beta, n, h, w, c):
    """Fold training-mode BN (batch stats) into per-lane (1, W*C) scale/shift."""
    st = stats.reshape(n, 2, w, c)
    s = jnp.sum(st[:, 0], axis=(0, 1))                   # (C,)
    ss = jnp.sum(st[:, 1], axis=(0, 1))                  # (C,)
    cnt = jnp.float32(n * h * w)
    mean = s / cnt
    var = ss / cnt - mean * mean                         # biased variance
    scale = gamma.astype(jnp.float32) * jax.lax.rsqrt(var + EPS)
    shift = beta.astype(jnp.float32) - mean * scale
    scale_row = jnp.broadcast_to(scale[None, :], (w, c)).reshape(1, w * c)
    shift_row = jnp.broadcast_to(shift[None, :], (w, c)).reshape(1, w * c)
    return scale_row, shift_row


def _per_sample_spec(a, b):
    return pl.BlockSpec((1, a, b), lambda i: (i, 0, 0))


def _shared_spec(shape):
    nd = len(shape)
    return pl.BlockSpec(shape, lambda i, nd=nd: (0,) * nd)


_PARALLEL = pltpu.CompilerParams(dimension_semantics=("parallel",))


@jax.jit
def residual_block(x_nchw, w1, g1, b1, w2, g2, b2):
    """x_nchw: (N, C, H, W); w1/w2: (Cout, Cin, 3, 3) PyTorch layout."""
    n, cin, h, w = x_nchw.shape
    cout = w1.shape[0]
    assert cin == cout, "residual add requires in_channels == out_channels"
    c = cout
    wc = w * c

    # Lane-dense row layout (wrapper-side layout plumbing only).
    x_rows = jnp.transpose(x_nchw, (0, 2, 3, 1)).astype(jnp.float32)
    x_rows = x_rows.reshape(n, h, wc)

    t1 = _toeplitz_weights(w1, w, cin, cout)             # (3, (W+2)*C, W*C)
    t2 = _toeplitz_weights(w2, w, cout, cout)

    # ---- phase 1: conv1 + BN1 batch-stat partials ---------------------------
    y1, st1 = pl.pallas_call(
        functools.partial(conv1_kernel, c=c),
        out_shape=(jax.ShapeDtypeStruct((n, h, wc), jnp.float32),
                   jax.ShapeDtypeStruct((n, 2, wc), jnp.float32)),
        grid_spec=pltpu.PrefetchScalarGridSpec(
            num_scalar_prefetch=0,
            grid=(n,),
            in_specs=[_per_sample_spec(h, wc), _shared_spec(t1.shape)],
            out_specs=(_per_sample_spec(h, wc),
                       pl.BlockSpec((1, 2, wc), lambda i: (i, 0, 0))),
        ),
        compiler_params=_PARALLEL,
    )(x_rows, t1)

    sc1, sh1 = _bn_scale_shift_rows(st1, g1, b1, n, h, w, c)

    # ---- phase 2: BN1-apply + ReLU + conv2 + BN2 batch-stat partials --------
    y2, st2 = pl.pallas_call(
        functools.partial(bn1_relu_conv2_kernel, c=c),
        out_shape=(jax.ShapeDtypeStruct((n, h, wc), jnp.float32),
                   jax.ShapeDtypeStruct((n, 2, wc), jnp.float32)),
        grid_spec=pltpu.PrefetchScalarGridSpec(
            num_scalar_prefetch=0,
            grid=(n,),
            in_specs=[_per_sample_spec(h, wc), _shared_spec(sc1.shape),
                      _shared_spec(sh1.shape), _shared_spec(t2.shape)],
            out_specs=(_per_sample_spec(h, wc),
                       pl.BlockSpec((1, 2, wc), lambda i: (i, 0, 0))),
        ),
        compiler_params=_PARALLEL,
    )(y1, sc1, sh1, t2)

    sc2, sh2 = _bn_scale_shift_rows(st2, g2, b2, n, h, w, c)

    # ---- phase 3: BN2-apply + residual add + ReLU ---------------------------
    out_rows = pl.pallas_call(
        bn2_add_relu_kernel,
        out_shape=jax.ShapeDtypeStruct((n, h, wc), jnp.float32),
        grid_spec=pltpu.PrefetchScalarGridSpec(
            num_scalar_prefetch=0,
            grid=(n,),
            in_specs=[_per_sample_spec(h, wc), _per_sample_spec(h, wc),
                      _shared_spec(sc2.shape), _shared_spec(sh2.shape)],
            out_specs=_per_sample_spec(h, wc),
        ),
        compiler_params=_PARALLEL,
    )(y2, x_rows, sc2, sh2)

    # Back to PyTorch NCHW.
    return jnp.transpose(out_rows.reshape(n, h, w, c), (0, 3, 1, 2))


# ---------------------------------------------------------------------------
# Pure-JAX reference (training-mode BatchNorm, biased variance)
# ---------------------------------------------------------------------------
def _reference(x, w1, g1, b1, w2, g2, b2):
    def conv(t, wgt):
        return jax.lax.conv_general_dilated(
            t, wgt, (1, 1), ((1, 1), (1, 1)),
            dimension_numbers=('NCHW', 'OIHW', 'NCHW'))

    def bn(t, g, b):
        m = jnp.mean(t, axis=(0, 2, 3), keepdims=True)
        v = jnp.mean((t - m) ** 2, axis=(0, 2, 3), keepdims=True)
        return ((t - m) * jax.lax.rsqrt(v + EPS)
                * g.reshape(1, -1, 1, 1) + b.reshape(1, -1, 1, 1))

    h = jax.nn.relu(bn(conv(x, w1), g1, b1))
    h = bn(conv(h, w2), g2, b2)
    return jax.nn.relu(h + x)


if __name__ == "__main__":
    N, C, H, W = 2, 4, 16, 16
    key = jax.random.PRNGKey(0)
    kx, kw1, kw2 = jax.random.split(key, 3)

    x = jax.random.normal(kx, (N, C, H, W), dtype=jnp.float32)
    w1 = jax.random.normal(kw1, (C, C, 3, 3), dtype=jnp.float32) * 0.1
    w2 = jax.random.normal(kw2, (C, C, 3, 3), dtype=jnp.float32) * 0.1
    g1 = jnp.ones((C,), jnp.float32)   # BatchNorm2d default weight
    b1 = jnp.zeros((C,), jnp.float32)  # BatchNorm2d default bias
    g2 = jnp.ones((C,), jnp.float32)
    b2 = jnp.zeros((C,), jnp.float32)

    out = jax.block_until_ready(residual_block(x, w1, g1, b1, w2, g2, b2))
    ref = jax.block_until_ready(_reference(x, w1, g1, b1, w2, g2, b2))
    if not bool(jnp.allclose(out, ref, atol=1e-4, rtol=1e-4)):
        raise AssertionError("Pallas kernel output mismatch vs reference")

    print("KERNEL_OK")
</pallas_src>

<mosaic_0001>
module attributes {stable_mosaic.version = 11 : i64} {
  func.func @conv1_kernel(%arg0: i32, %arg1: memref<1x16x64xf32, #tpu.memory_space<vmem>>, %arg2: memref<3x72x64xf32, #tpu.memory_space<vmem>>, %arg3: memref<1x16x64xf32, #tpu.memory_space<vmem>>, %arg4: memref<1x2x64xf32, #tpu.memory_space<vmem>>) attributes {dimension_semantics = [#tpu.dimension_semantics<parallel>], iteration_bounds = array<i64: 2>, scalar_prefetch = 0 : i64, scratch_operands = 0 : i64, tpu.core_type = #tpu.core_type<tc>, window_params = [{transform_indices = @transform_0, window_bounds = array<i64: 1, 16, 64>}, {pipeline_mode = #tpu.pipeline_mode<synchronous>, transform_indices = @transform_1, window_bounds = array<i64: 3, 72, 64>}, {transform_indices = @transform_2, window_bounds = array<i64: 1, 16, 64>}, {transform_indices = @transform_3, window_bounds = array<i64: 1, 2, 64>}]} {
    %c0 = arith.constant 0 : index
    %c0_0 = arith.constant 0 : index
    %c0_1 = arith.constant 0 : index
    %0 = vector.load %arg1[%c0, %c0_0, %c0_1] : memref<1x16x64xf32, #tpu.memory_space<vmem>>, vector<1x16x64xf32>
    %1 = vector.shape_cast %0 : vector<1x16x64xf32> to vector<16x64xf32>
    %cst = arith.constant 0.000000e+00 : f32
    %2 = vector.broadcast %cst : f32 to vector<16x4xf32>
    %cst_2 = arith.constant 0.000000e+00 : f32
    %3 = vector.broadcast %cst_2 : f32 to vector<1x72xf32>
    %4 = tpu.concatenate %2, %1, %2 in 1 : vector<16x4xf32>, vector<16x64xf32>, vector<16x4xf32> -> vector<16x72xf32>
    %5 = tpu.concatenate %3, %4, %3 in 0 : vector<1x72xf32>, vector<16x72xf32>, vector<1x72xf32> -> vector<18x72xf32>
    %6 = vector.extract_strided_slice %5 {offsets = [0, 0], sizes = [16, 72], strides = [1, 1]} : vector<18x72xf32> to vector<16x72xf32>
    %c0_3 = arith.constant 0 : index
    %c0_4 = arith.constant 0 : index
    %c0_5 = arith.constant 0 : index
    %7 = vector.load %arg2[%c0_3, %c0_4, %c0_5] : memref<3x72x64xf32, #tpu.memory_space<vmem>>, vector<1x72x64xf32>
    %8 = vector.shape_cast %7 : vector<1x72x64xf32> to vector<72x64xf32>
    %cst_6 = arith.constant dense<0.000000e+00> : vector<16x64xf32>
    %9 = tpu.matmul %6, %8, %cst_6 {dimension_numbers = #tpu.dot_dimension_numbers<[1], [0], [0], [1], [0, 0, 1, 1], [], []>} : vector<16x72xf32>, vector<72x64xf32>, vector<16x64xf32> -> vector<16x64xf32>
    %10 = vector.extract_strided_slice %5 {offsets = [1, 0], sizes = [16, 72], strides = [1, 1]} : vector<18x72xf32> to vector<16x72xf32>
    %c1 = arith.constant 1 : index
    %c0_7 = arith.constant 0 : index
    %c0_8 = arith.constant 0 : index
    %11 = vector.load %arg2[%c1, %c0_7, %c0_8] : memref<3x72x64xf32, #tpu.memory_space<vmem>>, vector<1x72x64xf32>
    %12 = vector.shape_cast %11 : vector<1x72x64xf32> to vector<72x64xf32>
    %cst_9 = arith.constant dense<0.000000e+00> : vector<16x64xf32>
    %13 = tpu.matmul %10, %12, %cst_9 {dimension_numbers = #tpu.dot_dimension_numbers<[1], [0], [0], [1], [0, 0, 1, 1], [], []>} : vector<16x72xf32>, vector<72x64xf32>, vector<16x64xf32> -> vector<16x64xf32>
    %14 = arith.addf %9, %13 : vector<16x64xf32>
    %15 = vector.extract_strided_slice %5 {offsets = [2, 0], sizes = [16, 72], strides = [1, 1]} : vector<18x72xf32> to vector<16x72xf32>
    %c2 = arith.constant 2 : index
    %c0_10 = arith.constant 0 : index
    %c0_11 = arith.constant 0 : index
    %16 = vector.load %arg2[%c2, %c0_10, %c0_11] : memref<3x72x64xf32, #tpu.memory_space<vmem>>, vector<1x72x64xf32>
    %17 = vector.shape_cast %16 : vector<1x72x64xf32> to vector<72x64xf32>
    %cst_12 = arith.constant dense<0.000000e+00> : vector<16x64xf32>
    %18 = tpu.matmul %15, %17, %cst_12 {dimension_numbers = #tpu.dot_dimension_numbers<[1], [0], [0], [1], [0, 0, 1, 1], [], []>} : vector<16x72xf32>, vector<72x64xf32>, vector<16x64xf32> -> vector<16x64xf32>
    %19 = arith.addf %14, %18 : vector<16x64xf32>
    %c0_13 = arith.constant 0 : index
    %c0_14 = arith.constant 0 : index
    %c0_15 = arith.constant 0 : index
    %20 = vector.load %arg3[%c0_13, %c0_14, %c0_15] : memref<1x16x64xf32, #tpu.memory_space<vmem>>, vector<1x16x64xf32>
    %21 = vector.shape_cast %20 : vector<1x16x64xf32> to vector<16x64xf32>
    %22 = vector.shape_cast %19 : vector<16x64xf32> to vector<1x16x64xf32>
    tpu.vector_store %arg3[%c0_13, %c0_14, %c0_15], %22 {strides = array<i32>} : memref<1x16x64xf32, #tpu.memory_space<vmem>>, vector<1x16x64xf32>,
    %cst_16 = arith.constant dense<0.000000e+00> : vector<64xf32>
    %23 = vector.multi_reduction <add>, %19, %cst_16 [0] : vector<16x64xf32> to vector<64xf32>
    %24 = vector.shape_cast %23 : vector<64xf32> to vector<1x64xf32>
    %25 = arith.mulf %19, %19 : vector<16x64xf32>
    %cst_17 = arith.constant dense<0.000000e+00> : vector<64xf32>
    %26 = vector.multi_reduction <add>, %25, %cst_17 [0] : vector<16x64xf32> to vector<64xf32>
    %27 = vector.shape_cast %26 : vector<64xf32> to vector<1x64xf32>
    %28 = tpu.concatenate %24, %27 in 0 : vector<1x64xf32>, vector<1x64xf32> -> vector<2x64xf32>
    %c0_18 = arith.constant 0 : index
    %c0_19 = arith.constant 0 : index
    %c0_20 = arith.constant 0 : index
    %29 = vector.load %arg4[%c0_18, %c0_19, %c0_20] : memref<1x2x64xf32, #tpu.memory_space<vmem>>, vector<1x2x64xf32>
    %30 = vector.shape_cast %29 : vector<1x2x64xf32> to vector<2x64xf32>
    %31 = vector.shape_cast %28 : vector<2x64xf32> to vector<1x2x64xf32>
    tpu.vector_store %arg4[%c0_18, %c0_19, %c0_20], %31 {strides = array<i32>} : memref<1x2x64xf32, #tpu.memory_space<vmem>>, vector<1x2x64xf32>,
    return
  }
  func.func @transform_0(%arg0: i32) -> (i32, i32, i32) {
    %c0_i32 = arith.constant 0 : i32
    %c0_i32_0 = arith.constant 0 : i32
    %c0_i32_1 = arith.constant 0 : i32
    return %arg0, %c0_i32, %c0_i32_0 : i32, i32, i32
  }
  func.func @transform_1(%arg0: i32) -> (i32, i32, i32) {
    %c0_i32 = arith.constant 0 : i32
    %c0_i32_0 = arith.constant 0 : i32
    %c0_i32_1 = arith.constant 0 : i32
    %c0_i32_2 = arith.constant 0 : i32
    return %c0_i32, %c0_i32_0, %c0_i32_1 : i32, i32, i32
  }
  func.func @transform_2(%arg0: i32) -> (i32, i32, i32) {
    %c0_i32 = arith.constant 0 : i32
    %c0_i32_0 = arith.constant 0 : i32
    %c0_i32_1 = arith.constant 0 : i32
    return %arg0, %c0_i32, %c0_i32_0 : i32, i32, i32
  }
  func.func @transform_3(%arg0: i32) -> (i32, i32, i32) {
    %c0_i32 = arith.constant 0 : i32
    %c0_i32_0 = arith.constant 0 : i32
    %c0_i32_1 = arith.constant 0 : i32
    return %arg0, %c0_i32, %c0_i32_0 : i32, i32, i32
  }
}

module attributes {stable_mosaic.version = 11 : i64} {
  func.func @bn1_relu_conv2_kernel(%arg0: i32, %arg1: memref<1x16x64xf32, #tpu.memory_space<vmem>>, %arg2: memref<1x64xf32, #tpu.memory_space<vmem>>, %arg3: memref<1x64xf32, #tpu.memory_space<vmem>>, %arg4: memref<3x72x64xf32, #tpu.memory_space<vmem>>, %arg5: memref<1x16x64xf32, #tpu.memory_space<vmem>>, %arg6: memref<1x2x64xf32, #tpu.memory_space<vmem>>) attributes {dimension_semantics = [#tpu.dimension_semantics<parallel>], iteration_bounds = array<i64: 2>, scalar_prefetch = 0 : i64, scratch_operands = 0 : i64, tpu.core_type = #tpu.core_type<tc>, window_params = [{transform_indices = @transform_0, window_bounds = array<i64: 1, 16, 64>}, {pipeline_mode = #tpu.pipeline_mode<synchronous>, transform_indices = @transform_1, window_bounds = array<i64: 1, 64>}, {pipeline_mode = #tpu.pipeline_mode<synchronous>, transform_indices = @transform_2, window_bounds = array<i64: 1, 64>}, {pipeline_mode = #tpu.pipeline_mode<synchronous>, transform_indices = @transform_3, window_bounds = array<i64: 3, 72, 64>}, {transform_indices = @transform_4, window_bounds = array<i64: 1, 16, 64>}, {transform_indices = @transform_5, window_bounds = array<i64: 1, 2, 64>}]} {
    %c0 = arith.constant 0 : index
    %c0_0 = arith.constant 0 : index
    %c0_1 = arith.constant 0 : index
    %0 = vector.load %arg1[%c0, %c0_0, %c0_1] : memref<1x16x64xf32, #tpu.memory_space<vmem>>, vector<1x16x64xf32>
    %1 = vector.shape_cast %0 : vector<1x16x64xf32> to vector<16x64xf32>
    %c0_2 = arith.constant 0 : index
    %c0_3 = arith.constant 0 : index
    %2 = vector.load %arg2[%c0_2, %c0_3] : memref<1x64xf32, #tpu.memory_space<vmem>>, vector<1x64xf32>
    %3 = vector.broadcast %2 : vector<1x64xf32> to vector<16x64xf32>
    %4 = arith.mulf %1, %3 : vector<16x64xf32>
    %c0_4 = arith.constant 0 : index
    %c0_5 = arith.constant 0 : index
    %5 = vector.load %arg3[%c0_4, %c0_5] : memref<1x64xf32, #tpu.memory_space<vmem>>, vector<1x64xf32>
    %6 = vector.broadcast %5 : vector<1x64xf32> to vector<16x64xf32>
    %7 = arith.addf %4, %6 : vector<16x64xf32>
    %cst = arith.constant 0.000000e+00 : f32
    %8 = vector.broadcast %cst : f32 to vector<16x64xf32>
    %9 = arith.maximumf %7, %8 : vector<16x64xf32>
    %cst_6 = arith.constant 0.000000e+00 : f32
    %10 = vector.broadcast %cst_6 : f32 to vector<16x4xf32>
    %cst_7 = arith.constant 0.000000e+00 : f32
    %11 = vector.broadcast %cst_7 : f32 to vector<1x72xf32>
    %12 = tpu.concatenate %10, %9, %10 in 1 : vector<16x4xf32>, vector<16x64xf32>, vector<16x4xf32> -> vector<16x72xf32>
    %13 = tpu.concatenate %11, %12, %11 in 0 : vector<1x72xf32>, vector<16x72xf32>, vector<1x72xf32> -> vector<18x72xf32>
    %14 = vector.extract_strided_slice %13 {offsets = [0, 0], sizes = [16, 72], strides = [1, 1]} : vector<18x72xf32> to vector<16x72xf32>
    %c0_8 = arith.constant 0 : index
    %c0_9 = arith.constant 0 : index
    %c0_10 = arith.constant 0 : index
    %15 = vector.load %arg4[%c0_8, %c0_9, %c0_10] : memref<3x72x64xf32, #tpu.memory_space<vmem>>, vector<1x72x64xf32>
    %16 = vector.shape_cast %15 : vector<1x72x64xf32> to vector<72x64xf32>
    %cst_11 = arith.constant dense<0.000000e+00> : vector<16x64xf32>
    %17 = tpu.matmul %14, %16, %cst_11 {dimension_numbers = #tpu.dot_dimension_numbers<[1], [0], [0], [1], [0, 0, 1, 1], [], []>} : vector<16x72xf32>, vector<72x64xf32>, vector<16x64xf32> -> vector<16x64xf32>
    %18 = vector.extract_strided_slice %13 {offsets = [1, 0], sizes = [16, 72], strides = [1, 1]} : vector<18x72xf32> to vector<16x72xf32>
    %c1 = arith.constant 1 : index
    %c0_12 = arith.constant 0 : index
    %c0_13 = arith.constant 0 : index
    %19 = vector.load %arg4[%c1, %c0_12, %c0_13] : memref<3x72x64xf32, #tpu.memory_space<vmem>>, vector<1x72x64xf32>
    %20 = vector.shape_cast %19 : vector<1x72x64xf32> to vector<72x64xf32>
    %cst_14 = arith.constant dense<0.000000e+00> : vector<16x64xf32>
    %21 = tpu.matmul %18, %20, %cst_14 {dimension_numbers = #tpu.dot_dimension_numbers<[1], [0], [0], [1], [0, 0, 1, 1], [], []>} : vector<16x72xf32>, vector<72x64xf32>, vector<16x64xf32> -> vector<16x64xf32>
    %22 = arith.addf %17, %21 : vector<16x64xf32>
    %23 = vector.extract_strided_slice %13 {offsets = [2, 0], sizes = [16, 72], strides = [1, 1]} : vector<18x72xf32> to vector<16x72xf32>
    %c2 = arith.constant 2 : index
    %c0_15 = arith.constant 0 : index
    %c0_16 = arith.constant 0 : index
    %24 = vector.load %arg4[%c2, %c0_15, %c0_16] : memref<3x72x64xf32, #tpu.memory_space<vmem>>, vector<1x72x64xf32>
    %25 = vector.shape_cast %24 : vector<1x72x64xf32> to vector<72x64xf32>
    %cst_17 = arith.constant dense<0.000000e+00> : vector<16x64xf32>
    %26 = tpu.matmul %23, %25, %cst_17 {dimension_numbers = #tpu.dot_dimension_numbers<[1], [0], [0], [1], [0, 0, 1, 1], [], []>} : vector<16x72xf32>, vector<72x64xf32>, vector<16x64xf32> -> vector<16x64xf32>
    %27 = arith.addf %22, %26 : vector<16x64xf32>
    %c0_18 = arith.constant 0 : index
    %c0_19 = arith.constant 0 : index
    %c0_20 = arith.constant 0 : index
    %28 = vector.load %arg5[%c0_18, %c0_19, %c0_20] : memref<1x16x64xf32, #tpu.memory_space<vmem>>, vector<1x16x64xf32>
    %29 = vector.shape_cast %28 : vector<1x16x64xf32> to vector<16x64xf32>
    %30 = vector.shape_cast %27 : vector<16x64xf32> to vector<1x16x64xf32>
    tpu.vector_store %arg5[%c0_18, %c0_19, %c0_20], %30 {strides = array<i32>} : memref<1x16x64xf32, #tpu.memory_space<vmem>>, vector<1x16x64xf32>,
    %cst_21 = arith.constant dense<0.000000e+00> : vector<64xf32>
    %31 = vector.multi_reduction <add>, %27, %cst_21 [0] : vector<16x64xf32> to vector<64xf32>
    %32 = vector.shape_cast %31 : vector<64xf32> to vector<1x64xf32>
    %33 = arith.mulf %27, %27 : vector<16x64xf32>
    %cst_22 = arith.constant dense<0.000000e+00> : vector<64xf32>
    %34 = vector.multi_reduction <add>, %33, %cst_22 [0] : vector<16x64xf32> to vector<64xf32>
    %35 = vector.shape_cast %34 : vector<64xf32> to vector<1x64xf32>
    %36 = tpu.concatenate %32, %35 in 0 : vector<1x64xf32>, vector<1x64xf32> -> vector<2x64xf32>
    %c0_23 = arith.constant 0 : index
    %c0_24 = arith.constant 0 : index
    %c0_25 = arith.constant 0 : index
    %37 = vector.load %arg6[%c0_23, %c0_24, %c0_25] : memref<1x2x64xf32, #tpu.memory_space<vmem>>, vector<1x2x64xf32>
    %38 = vector.shape_cast %37 : vector<1x2x64xf32> to vector<2x64xf32>
    %39 = vector.shape_cast %36 : vector<2x64xf32> to vector<1x2x64xf32>
    tpu.vector_store %arg6[%c0_23, %c0_24, %c0_25], %39 {strides = array<i32>} : memref<1x2x64xf32, #tpu.memory_space<vmem>>, vector<1x2x64xf32>,
    return
  }
  func.func @transform_0(%arg0: i32) -> (i32, i32, i32) {
    %c0_i32 = arith.constant 0 : i32
    %c0_i32_0 = arith.constant 0 : i32
    %c0_i32_1 = arith.constant 0 : i32
    return %arg0, %c0_i32, %c0_i32_0 : i32, i32, i32
  }
  func.func @transform_1(%arg0: i32) -> (i32, i32) {
    %c0_i32 = arith.constant 0 : i32
    %c0_i32_0 = arith.constant 0 : i32
    %c0_i32_1 = arith.constant 0 : i32
    return %c0_i32, %c0_i32_0 : i32, i32
  }
  func.func @transform_2(%arg0: i32) -> (i32, i32) {
    %c0_i32 = arith.constant 0 : i32
    %c0_i32_0 = arith.constant 0 : i32
    %c0_i32_1 = arith.constant 0 : i32
    return %c0_i32, %c0_i32_0 : i32, i32
  }
  func.func @transform_3(%arg0: i32) -> (i32, i32, i32) {
    %c0_i32 = arith.constant 0 : i32
    %c0_i32_0 = arith.constant 0 : i32
    %c0_i32_1 = arith.constant 0 : i32
    %c0_i32_2 = arith.constant 0 : i32
    return %c0_i32, %c0_i32_0, %c0_i32_1 : i32, i32, i32
  }
  func.func @transform_4(%arg0: i32) -> (i32, i32, i32) {
    %c0_i32 = arith.constant 0 : i32
    %c0_i32_0 = arith.constant 0 : i32
    %c0_i32_1 = arith.constant 0 : i32
    return %arg0, %c0_i32, %c0_i32_0 : i32, i32, i32
  }
  func.func @transform_5(%arg0: i32) -> (i32, i32, i32) {
    %c0_i32 = arith.constant 0 : i32
    %c0_i32_0 = arith.constant 0 : i32
    %c0_i32_1 = arith.constant 0 : i32
    return %arg0, %c0_i32, %c0_i32_0 : i32, i32, i32
  }
}

module attributes {stable_mosaic.version = 11 : i64} {
  func.func @bn2_add_relu_kernel(%arg0: i32, %arg1: memref<1x16x64xf32, #tpu.memory_space<vmem>>, %arg2: memref<1x16x64xf32, #tpu.memory_space<vmem>>, %arg3: memref<1x64xf32, #tpu.memory_space<vmem>>, %arg4: memref<1x64xf32, #tpu.memory_space<vmem>>, %arg5: memref<1x16x64xf32, #tpu.memory_space<vmem>>) attributes {dimension_semantics = [#tpu.dimension_semantics<parallel>], iteration_bounds = array<i64: 2>, scalar_prefetch = 0 : i64, scratch_operands = 0 : i64, tpu.core_type = #tpu.core_type<tc>, window_params = [{transform_indices = @transform_0, window_bounds = array<i64: 1, 16, 64>}, {transform_indices = @transform_1, window_bounds = array<i64: 1, 16, 64>}, {pipeline_mode = #tpu.pipeline_mode<synchronous>, transform_indices = @transform_2, window_bounds = array<i64: 1, 64>}, {pipeline_mode = #tpu.pipeline_mode<synchronous>, transform_indices = @transform_3, window_bounds = array<i64: 1, 64>}, {transform_indices = @transform_4, window_bounds = array<i64: 1, 16, 64>}]} {
    %c0 = arith.constant 0 : index
    %c0_0 = arith.constant 0 : index
    %c0_1 = arith.constant 0 : index
    %0 = vector.load %arg1[%c0, %c0_0, %c0_1] : memref<1x16x64xf32, #tpu.memory_space<vmem>>, vector<1x16x64xf32>
    %1 = vector.shape_cast %0 : vector<1x16x64xf32> to vector<16x64xf32>
    %c0_2 = arith.constant 0 : index
    %c0_3 = arith.constant 0 : index
    %2 = vector.load %arg3[%c0_2, %c0_3] : memref<1x64xf32, #tpu.memory_space<vmem>>, vector<1x64xf32>
    %3 = vector.broadcast %2 : vector<1x64xf32> to vector<16x64xf32>
    %4 = arith.mulf %1, %3 : vector<16x64xf32>
    %c0_4 = arith.constant 0 : index
    %c0_5 = arith.constant 0 : index
    %5 = vector.load %arg4[%c0_4, %c0_5] : memref<1x64xf32, #tpu.memory_space<vmem>>, vector<1x64xf32>
    %6 = vector.broadcast %5 : vector<1x64xf32> to vector<16x64xf32>
    %7 = arith.addf %4, %6 : vector<16x64xf32>
    %c0_6 = arith.constant 0 : index
    %c0_7 = arith.constant 0 : index
    %c0_8 = arith.constant 0 : index
    %8 = vector.load %arg2[%c0_6, %c0_7, %c0_8] : memref<1x16x64xf32, #tpu.memory_space<vmem>>, vector<1x16x64xf32>
    %9 = vector.shape_cast %8 : vector<1x16x64xf32> to vector<16x64xf32>
    %10 = arith.addf %7, %9 : vector<16x64xf32>
    %cst = arith.constant 0.000000e+00 : f32
    %11 = vector.broadcast %cst : f32 to vector<16x64xf32>
    %12 = arith.maximumf %10, %11 : vector<16x64xf32>
    %c0_9 = arith.constant 0 : index
    %c0_10 = arith.constant 0 : index
    %c0_11 = arith.constant 0 : index
    %13 = vector.load %arg5[%c0_9, %c0_10, %c0_11] : memref<1x16x64xf32, #tpu.memory_space<vmem>>, vector<1x16x64xf32>
    %14 = vector.shape_cast %13 : vector<1x16x64xf32> to vector<16x64xf32>
    %15 = vector.shape_cast %12 : vector<16x64xf32> to vector<1x16x64xf32>
    tpu.vector_store %arg5[%c0_9, %c0_10, %c0_11], %15 {strides = array<i32>} : memref<1x16x64xf32, #tpu.memory_space<vmem>>, vector<1x16x64xf32>,
    return
  }
  func.func @transform_0(%arg0: i32) -> (i32, i32, i32) {
    %c0_i32 = arith.constant 0 : i32
    %c0_i32_0 = arith.constant 0 : i32
    %c0_i32_1 = arith.constant 0 : i32
    return %arg0, %c0_i32, %c0_i32_0 : i32, i32, i32
  }
  func.func @transform_1(%arg0: i32) -> (i32, i32, i32) {
    %c0_i32 = arith.constant 0 : i32
    %c0_i32_0 = arith.constant 0 : i32
    %c0_i32_1 = arith.constant 0 : i32
    return %arg0, %c0_i32, %c0_i32_0 : i32, i32, i32
  }
  func.func @transform_2(%arg0: i32) -> (i32, i32) {
    %c0_i32 = arith.constant 0 : i32
    %c0_i32_0 = arith.constant 0 : i32
    %c0_i32_1 = arith.constant 0 : i32
    return %c0_i32, %c0_i32_0 : i32, i32
  }
  func.func @transform_3(%arg0: i32) -> (i32, i32) {
    %c0_i32 = arith.constant 0 : i32
    %c0_i32_0 = arith.constant 0 : i32
    %c0_i32_1 = arith.constant 0 : i32
    return %c0_i32, %c0_i32_0 : i32, i32
  }
  func.func @transform_4(%arg0: i32) -> (i32, i32, i32) {
    %c0_i32 = arith.constant 0 : i32
    %c0_i32_0 = arith.constant 0 : i32
    %c0_i32_1 = arith.constant 0 : i32
    return %arg0, %c0_i32, %c0_i32_0 : i32, i32, i32
  }
}

</mosaic_0001>

<bundles_post_ra>
// kernel: residual_block.3
= control target key start
LH: loop header
LB: loop body
LE: loop exit
PB: predicated region body
PF: predicated region fallthrough
CT: control target
= control target key end

     0   :  { %s532_s12 = smov 0   ;;  %s651_s0 = inlined_call_operand.vmem [shape: f32[2,16,64], index: 0, kind: input, shape index: {}]   ;;  %s652_s1 = inlined_call_operand.vmem [shape: f32[3,72,64], index: 1, kind: input, shape index: {}]   ;;  %s653_s2 = inlined_call_operand.vmem [shape: f32[2,16,64], index: 2, kind: output, shape index: {0}]   ;;  %s654_s3 = inlined_call_operand.vmem [shape: f32[2,2,64], index: 3, kind: output, shape index: {1}]  }
   0x1 LB: > { %s447_s13 = sadd.s32 4294967295, %s509_s12   ;;  %p451_p0 = scmp.ge.s32.totalorder %s509_s12, 1  ;;  %s509_s12 = sphi %s532_s12, %s14_s12  }
   0x2   : > { %p140_p1 = scmp.lt.s32.totalorder %s509_s12, 3 }
   0x4   : > { %p141_p2 = pnand %p451_p0, %p140_p1 }
   0x5   : > { %p168_p3 = scmp.lt.s32.totalorder (!%p141_p2), %s447_s13, 1  ;;  %s511_s5 = smov (!%p141_p2), 4  }
   0x6   : > { %144 = sbr.rel (%p141_p2) target bundleno = 308 (0x134), region = 28 }
   0xb   : > { %v216_v0 = vld [vmem:[%s652_s1 + $0x40] sm:$0xff]  ;;  %v215_v1 = vld [vmem:[%s652_s1 + $0x38] sm:$0xff]  ;;  %s656_s13 = smov (!%p168_p3, %s447_s13), 1  ;;  %v214_v2 = vld [vmem:[%s652_s1 + $0x30] sm:$0xff]  ;;  %vm192_vm0 = vcmask 31744   ;;  %vm195_vm1 = vcmask 556032  }
   0xc   : > { %274 = vmatpush.msra.mxu1 %v216_v0  ;;  %v465_v3 = vld [vmem:[%s652_s1 + $0x88] sm:$0xff]  ;;  %v478_v4 = vld [vmem:[%s652_s1 + $0xd0] sm:$0xff]  ;;  %s483_s24 = sshll.u32 %s656_s13, 4  ;;  %v212_v7 = vld [vmem:[%s652_s1 + $0x20] sm:$0xff]  ;;  %vm200_vm2 = vcmask 1040384   ;;  %vm235_vm3 = vcmask 588800  }
   0xd   : > { %247 = vmatpush.msra.mxu0 %v465_v3  ;;  %v213_v5 = vld [vmem:[%s652_s1 + $0x28] sm:$0xff]  ;;  %485 = vmatpush.msra.mxu3 %v465_v3  ;;  %s172_s29 = scalar_lea.vmem %s651_s0, %s483_s24  ;;  %v211_v8 = vld [vmem:[%s652_s1 + $0x18] sm:$0xff]  ;;  %v210_v10 = vld [vmem:[%s652_s1 + $0x10] sm:$0xff]  ;;  %vm229_vm4 = vcmask 1046528   ;;  %vm300_vm5 = vcmask 1045504   ;;  %s177_s27 = scalar_lea.vmem %s653_s2, %s483_s24  ;;  %vm335_vm6 = vcmask 523264  }
   0xe   : > { %275 = vmatpush.msra.mxu1 %v215_v1  ;;  %317 = vmatpush.msra.mxu2 %v478_v4  ;;  %v182_v6 = vld [vmem:[%s172_s29] sm:$0xff]  ;;  %v183_v9 = vld [vmem:[%s172_s29 + $0x8] sm:$0xff]  ;;  %v463_v14 = vld [vmem:[%s652_s1 + $0x78] sm:$0xff]  ;;  %s456_s24 = sshll.u32 %s656_s13, 1  ;;  %vm359_vm7 = vcmask 517120  }
   0xf   : > { %186 = vrot.lane.b32.xlu0 %v182_v6, %s511_s5  ;;  %v464_v11 = vld [vmem:[%s652_s1 + $0x80] sm:$0xff]  ;;  %v477_v12 = vld [vmem:[%s652_s1 + $0xc8] sm:$0xff]  ;;  %v462_v17 = vld [vmem:[%s652_s1 + $0x70] sm:$0xff]  ;;  %s181_s30 = scalar_lea.vmem %s654_s3, %s456_s24 }
  0x10   : > { %276 = vmatpush.msra.mxu1 %v214_v2  ;;  %248 = vmatpush.msra.mxu0 %v464_v11  ;;  %v209_v13 = vld [vmem:[%s652_s1 + $0x8] sm:$0xff]  ;;  %v476_v15 = vld [vmem:[%s652_s1 + $0xc0] sm:$0xff]  ;;  %v475_v18 = vld [vmem:[%s652_s1 + $0xb8] sm:$0xff] }
  0x11   : > { %486 = vmatpush.msra.mxu3 %v464_v11  ;;  %318 = vmatpush.msra.mxu2 %v477_v12  ;;  %v208_v16 = vld [vmem:[%s652_s1] sm:$0xff]  ;;  %v461_v19 = vld [vmem:[%s652_s1 + $0x68] sm:$0xff]  ;;  %v474_v20 = vld [vmem:[%s652_s1 + $0xb0] sm:$0xff] }
  0x12   : > { %277 = vmatpush.msra.mxu1 %v213_v5  ;;  %249 = vmatpush.msra.mxu0 %v463_v14  ;;  %v460_v21 = vld [vmem:[%s652_s1 + $0x60] sm:$0xff]  ;;  %v473_v22 = vld [vmem:[%s652_s1 + $0xa8] sm:$0xff]  ;;  %v459_v23 = vld [vmem:[%s652_s1 + $0x58] sm:$0xff] }
  0x13   : > { %487 = vmatpush.msra.mxu3 %v463_v14  ;;  %319 = vmatpush.msra.mxu2 %v476_v15  ;;  %v472_v24 = vld [vmem:[%s652_s1 + $0xa0] sm:$0xff]  ;;  %v458_v25 = vld [vmem:[%s652_s1 + $0x50] sm:$0xff]  ;;  %v471_v26 = vld [vmem:[%s652_s1 + $0x98] sm:$0xff] }
  0x14   : > { %278 = vmatpush.msra.mxu1 %v212_v7  ;;  %250 = vmatpush.msra.mxu0 %v462_v17  ;;  %v457_v27 = vld [vmem:[%s652_s1 + $0x48] sm:$0xff]  ;;  %v470_v28 = vld [vmem:[%s652_s1 + $0x90] sm:$0xff] }
  0x15   : > { %488 = vmatpush.msra.mxu3 %v462_v17  ;;  %320 = vmatpush.msra.mxu2 %v475_v18 }
  0x16   : > { %279 = vmatpush.msra.mxu1 %v211_v8  ;;  %251 = vmatpush.msra.mxu0 %v461_v19 }
  0x17   : > { %188 = vrot.lane.b32.xlu0 %v183_v9, %s511_s5  ;;  %489 = vmatpush.msra.mxu3 %v461_v19 }
  0x18   : > { %280 = vmatpush.msra.mxu1 %v210_v10  ;;  %321 = vmatpush.msra.mxu2 %v474_v20 }
  0x19   : > { %252 = vmatpush.msra.mxu0 %v460_v21  ;;  %490 = vmatpush.msra.mxu3 %v460_v21 }
  0x1a   : > { %281 = vmatpush.msra.mxu1 %v209_v13  ;;  %322 = vmatpush.msra.mxu2 %v473_v22 }
  0x1b   : > { %253 = vmatpush.msra.mxu0 %v459_v23  ;;  %491 = vmatpush.msra.mxu3 %v459_v23 }
  0x1c   : > { %282 = vmatpush.msra.mxu1 %v208_v16  ;;  %323 = vmatpush.msra.mxu2 %v472_v24 }
  0x1d   : > { %254 = vmatpush.msra.mxu0 %v458_v25  ;;  %492 = vmatpush.msra.mxu3 %v458_v25 }
  0x1e   : > { %324 = vmatpush.msra.mxu2 %v471_v26 }
  0x1f   : > { %255 = vmatpush.msra.mxu0 %v457_v27  ;;  %493 = vmatpush.msra.mxu3 %v457_v27 }
  0x20   : > { %325 = vmatpush.msra.mxu2 %v470_v28 }
  0x81   : > { %v187_v29 = vpop.permute.xlu0 %186 }
  0x82   : > { %v193_v30 = vsel %vm192_vm0, 0.0, %v187_v29 }
  0x83   : > { %v196_v31 = vsel %vm195_vm1, %v193_v30, 0.0 }
  0x84   : > { %v201_v32 = vrot.slane %v196_v31, 7 }
  0x86   : > { %v206_v33 = vsel %vm200_vm2, 0.0, %v201_v32 }
  0x87   : > { %468 = vmatmul.msk.f32.vlgmr.msra.gmra.mxu1 %vm235_vm3, %v206_v33  ;;  %v230_v38 = vrot.slane %v206_v33, 1  ;;  %v301_v41 = vrot.slane %v206_v33, 2 }
  0x89   : > { %v189_v34 = vpop.permute.xlu0 %188 }
  0x8a   : > { %v194_v35 = vsel %vm192_vm0, 0.0, %v189_v34 }
  0x8b   : > { %v197_v36 = vsel %vm195_vm1, %v194_v35, 0.0 }
  0x8c   : > { %v202_v37 = vrot.slane %v197_v36, 7 }
  0x8e   : > { %v207_v39 = vsel %vm200_vm2, %v202_v37, 0.0  ;;  %v203_v40 = vsel %vm200_vm2, %v201_v32, %v202_v37 }
  0x8f   : > { %v233_v42 = vrot.slane %v207_v39, 1  ;;  %v231_v43 = vrot.slane %v203_v40, 1  ;;  %469 = vmatmul.msk.f32.gmra.mxu1 %vm235_vm3, %v203_v40  ;;  %v302_v44 = vrot.slane %v203_v40, 2  ;;  %v304_v48 = vrot.slane %v207_v39, 2 }
  0x91   : > { %v232_v45 = vsel %vm229_vm4, %v230_v38, %v231_v43  ;;  %v234_v46 = vsel %vm229_vm4, %v231_v43, %v233_v42  ;;  %v303_v47 = vsel %vm300_vm5, %v301_v41, %v302_v44  ;;  %v305_v49 = vsel %vm300_vm5, %v302_v44, %v304_v48 }
  0x92   : > { %466 = vmatmul.msk.f32.vlgmr.msra.gmra.mxu0 %vm235_vm3, %v232_v45  ;;  %467 = vmatmul.msk.f32.vlgmr.msra.gmra.mxu3 %vm235_vm3, %v234_v46 }
  0x93   : > { %479 = vmatmul.msk.f32.vlgmr.msra.gmra.mxu2 %vm235_vm3, %v303_v47 }
  0x9b   : > { %480 = vmatmul.msk.f32.gmra.mxu2 %vm235_vm3, %v305_v49 }
 0x104   : > { %v284_v50 = vpop.f32.mrf.mxu1 }
 0x10c   : > { %v287_v56 = vpop.f32.mrf.mxu1 }
 0x10f   : > { %v257_v51 = vpop.f32.mrf.mxu0 }
 0x110   : > { %v285_v52 = vadd.f32 %v284_v50, %v257_v51 }
 0x115   : > { %v260_v55 = vpop.f32.mrf.mxu3 }
 0x116   : > { %v327_v53 = vpop.f32.mrf.mxu2  ;;  %v288_v57 = vadd.f32 %v287_v56, %v260_v55 }
 0x117   : > { %v333_v54 = vadd.f32 %v327_v53, %v285_v52 }
 0x119   : > { %336 = vst.msk [vmem:[%s177_s27] sm:$0xff] %vm335_vm6, %v333_v54  ;;  %v347_v59 = vmul.f32 %v333_v54, %v333_v54  ;;  %v338_v61 = vsel %vm335_vm6, %v333_v54, 0.0 }
 0x11b   : > { %v349_v1 = vsel %vm335_vm6, %v347_v59, 0.0 }
 0x11e   : > { %v330_v58 = vpop.f32.mrf.mxu2 }
 0x11f   : > { %v334_v60 = vadd.f32 %v330_v58, %v288_v57 }
 0x121   : > { %337 = vst.msk [vmem:[%s177_s27 + $0x8] sm:$0xff] %vm335_vm6, %v334_v60  ;;  %v339_v62 = vsel %vm335_vm6, %v334_v60, 0.0  ;;  %v348_v63 = vmul.f32 %v334_v60, %v334_v60 }
 0x122   : > { %v340_v0 = vadd.f32 %v339_v62, %v338_v61 }
 0x123   : > { %v350_v2 = vsel %vm335_vm6, %v348_v63, 0.0 }
 0x124   : > { %v341_v3 = vrot.slane %v340_v0, 4  ;;  %v351_v4 = vadd.f32 %v350_v2, %v349_v1 }
 0x126   : > { %v342_v5 = vadd.f32 %v341_v3, %v340_v0  ;;  %v352_v6 = vrot.slane %v351_v4, 4 }
 0x128   : > { %v343_v7 = vrot.slane %v342_v5, 2  ;;  %v353_v8 = vadd.f32 %v352_v6, %v351_v4 }
 0x12a   : > { %v344_v9 = vadd.f32 %v343_v7, %v342_v5  ;;  %v354_v10 = vrot.slane %v353_v8, 2 }
 0x12c   : > { %v345_v11 = vrot.slane %v344_v9, 1  ;;  %v355_v12 = vadd.f32 %v354_v10, %v353_v8 }
 0x12e   : > { %v356_v13 = vrot.slane %v355_v12, 1  ;;  %v346_v14 = vadd.f32 %v345_v11, %v344_v9 }
 0x130   : > { %v357_v15 = vadd.f32 %v356_v13, %v355_v12 }
 0x132   : > { %v358_v16 = vsel %vm200_vm2, %v346_v14, %v357_v15 }
 0x133   : > { %360 = vst.msk [vmem:[%s181_s30] sm:$0x3] %vm359_vm7, %v358_v16 }
 0x134 PF: > { %s14_s12 = sadd.s32 1, %s509_s12  }
 0x135   : > { %p11_p4 = scmp.ge.s32.totalorder %s14_s12, 4  }
 0x137   :  { %13 = sbr.rel (!%p11_p4) target bundleno = 1 (0x1), region = 72 }

// kernel: residual_block.4
= control target key start
LH: loop header
LB: loop body
LE: loop exit
PB: predicated region body
PF: predicated region fallthrough
CT: control target
= control target key end

     0   :  { %s612_s18 = smov 0   ;;  %s737_s0 = inlined_call_operand.vmem [shape: f32[2,16,64], index: 0, kind: input, shape index: {}]   ;;  %s738_s1 = inlined_call_operand.vmem [shape: f32[1,64], index: 1, kind: input, shape index: {}]   ;;  %s739_s2 = inlined_call_operand.vmem [shape: f32[1,64], index: 2, kind: input, shape index: {}]   ;;  %s740_s3 = inlined_call_operand.vmem [shape: f32[3,72,64], index: 3, kind: input, shape index: {}]   ;;  %s741_s4 = inlined_call_operand.vmem [shape: f32[2,16,64], index: 4, kind: output, shape index: {0}]   ;;  %s742_s5 = inlined_call_operand.vmem [shape: f32[2,2,64], index: 5, kind: output, shape index: {1}]  }
   0x1 LB: > { %s515_s19 = sadd.s32 4294967295, %s579_s18   ;;  %p519_p0 = scmp.ge.s32.totalorder %s579_s18, 1  ;;  %s579_s18 = sphi %s612_s18, %s16_s18  }
   0x2   : > { %p190_p1 = scmp.lt.s32.totalorder %s579_s18, 3 }
   0x4   : > { %p191_p2 = pnand %p519_p0, %p190_p1 }
   0x5   : > { %p222_p3 = scmp.lt.s32.totalorder (!%p191_p2), %s515_s19, 1  ;;  %s581_s21 = smov (!%p191_p2), 4  }
   0x6   : > { %194 = sbr.rel (%p191_p2) target bundleno = 314 (0x13a), region = 36 }
   0xb   : > { %v284_v0 = vld [vmem:[%s740_s3 + $0x40] sm:$0xff]  ;;  %s744_s19 = smov (!%p222_p3, %s515_s19), 1  ;;  %v283_v1 = vld [vmem:[%s740_s3 + $0x38] sm:$0xff]  ;;  %v282_v3 = vld [vmem:[%s740_s3 + $0x30] sm:$0xff]  ;;  %vm260_vm0 = vcmask 31744   ;;  %vm263_vm1 = vcmask 556032  }
   0xc   : > { %342 = vmatpush.msra.mxu1 %v284_v0  ;;  %v571_v2 = vld [vmem:[%s738_s1] ss:$0 sm:$0xff]  ;;  %v533_v4 = vld [vmem:[%s740_s3 + $0x88] sm:$0xff]  ;;  %s551_s30 = sshll.u32 %s744_s19, 4  ;;  %v546_v5 = vld [vmem:[%s740_s3 + $0xd0] sm:$0xff]  ;;  %vm268_vm2 = vcmask 1040384  }
   0xd   : > { %315 = vmatpush.msra.mxu0 %v533_v4  ;;  %s226_s10 = scalar_lea.vmem %s737_s0, %s551_s30  ;;  %v572_v6 = vld [vmem:[%s739_s2] ss:$0 sm:$0xff]  ;;  %v281_v7 = vld [vmem:[%s740_s3 + $0x28] sm:$0xff]  ;;  %553 = vmatpush.msra.mxu3 %v533_v4  ;;  %v279_v14 = vld [vmem:[%s740_s3 + $0x18] sm:$0xff]  ;;  %vm303_vm3 = vcmask 588800   ;;  %vm297_vm4 = vcmask 1046528   ;;  %s231_s16 = scalar_lea.vmem %s741_s4, %s551_s30 }
   0xe   : > { %343 = vmatpush.msra.mxu1 %v283_v1  ;;  %385 = vmatpush.msra.mxu2 %v546_v5  ;;  %v236_v8 = vld [vmem:[%s226_s10] sm:$0xff]  ;;  %v237_v9 = vld [vmem:[%s226_s10 + $0x8] sm:$0xff]  ;;  %v278_v18 = vld [vmem:[%s740_s3 + $0x10] sm:$0xff]  ;;  %vm368_vm5 = vcmask 1045504   ;;  %vm403_vm6 = vcmask 523264   ;;  %s524_s30 = sshll.u32 %s744_s19, 1 }
   0xf   : > { %v242_v10 = vmul.f32 %v571_v2, %v236_v8  ;;  %v280_v11 = vld [vmem:[%s740_s3 + $0x20] sm:$0xff]  ;;  %v243_v13 = vmul.f32 %v571_v2, %v237_v9  ;;  %v545_v20 = vld [vmem:[%s740_s3 + $0xc8] sm:$0xff]  ;;  %v531_v22 = vld [vmem:[%s740_s3 + $0x78] sm:$0xff]  ;;  %vm427_vm7 = vcmask 517120  }
  0x10   : > { %344 = vmatpush.msra.mxu1 %v282_v3  ;;  %v532_v19 = vld [vmem:[%s740_s3 + $0x80] sm:$0xff]  ;;  %v277_v21 = vld [vmem:[%s740_s3 + $0x8] sm:$0xff]  ;;  %386 = vmatpush.msra.mxu2 %v545_v20  ;;  %v530_v25 = vld [vmem:[%s740_s3 + $0x70] sm:$0xff] }
  0x11   : > { %v248_v12 = vadd.f32 %v572_v6, %v242_v10  ;;  %v249_v16 = vadd.f32 %v572_v6, %v243_v13  ;;  %316 = vmatpush.msra.mxu0 %v532_v19  ;;  %554 = vmatpush.msra.mxu3 %v532_v19  ;;  %v544_v23 = vld [vmem:[%s740_s3 + $0xc0] sm:$0xff]  ;;  %v543_v26 = vld [vmem:[%s740_s3 + $0xb8] sm:$0xff]  ;;  %v529_v27 = vld [vmem:[%s740_s3 + $0x68] sm:$0xff] }
  0x12   : > { %345 = vmatpush.msra.mxu1 %v281_v7  ;;  %v276_v24 = vld [vmem:[%s740_s3] sm:$0xff]  ;;  %387 = vmatpush.msra.mxu2 %v544_v23  ;;  %v542_v28 = vld [vmem:[%s740_s3 + $0xb0] sm:$0xff]  ;;  %v541_v30 = vld [vmem:[%s740_s3 + $0xa8] sm:$0xff] }
  0x13   : > { %v250_v15 = vmax.f32 %v248_v12, 0.0  ;;  %v251_v17 = vmax.f32 %v249_v16, 0.0  ;;  %317 = vmatpush.msra.mxu0 %v531_v22  ;;  %555 = vmatpush.msra.mxu3 %v531_v22  ;;  %v528_v29 = vld [vmem:[%s740_s3 + $0x60] sm:$0xff]  ;;  %v527_v31 = vld [vmem:[%s740_s3 + $0x58] sm:$0xff]  ;;  %v526_v33 = vld [vmem:[%s740_s3 + $0x50] sm:$0xff] }
  0x14   : > { %346 = vmatpush.msra.mxu1 %v280_v11  ;;  %388 = vmatpush.msra.mxu2 %v543_v26  ;;  %v540_v32 = vld [vmem:[%s740_s3 + $0xa0] sm:$0xff]  ;;  %v539_v34 = vld [vmem:[%s740_s3 + $0x98] sm:$0xff]  ;;  %v525_v35 = vld [vmem:[%s740_s3 + $0x48] sm:$0xff] }
  0x15   : > { %254 = vrot.lane.b32.xlu0 %v250_v15, %s581_s21  ;;  %318 = vmatpush.msra.mxu0 %v530_v25  ;;  %v538_v36 = vld [vmem:[%s740_s3 + $0x90] sm:$0xff] }
  0x16   : > { %347 = vmatpush.msra.mxu1 %v279_v14  ;;  %556 = vmatpush.msra.mxu3 %v530_v25 }
  0x17   : > { %319 = vmatpush.msra.mxu0 %v529_v27  ;;  %389 = vmatpush.msra.mxu2 %v542_v28 }
  0x18   : > { %348 = vmatpush.msra.mxu1 %v278_v18  ;;  %557 = vmatpush.msra.mxu3 %v529_v27 }
  0x19   : > { %320 = vmatpush.msra.mxu0 %v528_v29  ;;  %390 = vmatpush.msra.mxu2 %v541_v30 }
  0x1a   : > { %349 = vmatpush.msra.mxu1 %v277_v21  ;;  %558 = vmatpush.msra.mxu3 %v528_v29 }
  0x1b   : > { %321 = vmatpush.msra.mxu0 %v527_v31  ;;  %391 = vmatpush.msra.mxu2 %v540_v32 }
  0x1c   : > { %350 = vmatpush.msra.mxu1 %v276_v24  ;;  %559 = vmatpush.msra.mxu3 %v527_v31 }
  0x1d   : > { %256 = vrot.lane.b32.xlu0 %v251_v17, %s581_s21  ;;  %322 = vmatpush.msra.mxu0 %v526_v33  ;;  %s235_s21 = scalar_lea.vmem %s742_s5, %s524_s30 }
  0x1e   : > { %560 = vmatpush.msra.mxu3 %v526_v33  ;;  %392 = vmatpush.msra.mxu2 %v539_v34 }
  0x1f   : > { %323 = vmatpush.msra.mxu0 %v525_v35 }
  0x20   : > { %561 = vmatpush.msra.mxu3 %v525_v35  ;;  %393 = vmatpush.msra.mxu2 %v538_v36 }
  0x87   : > { %v255_v37 = vpop.permute.xlu0 %254 }
  0x88   : > { %v261_v38 = vsel %vm260_vm0, 0.0, %v255_v37 }
  0x89   : > { %v264_v39 = vsel %vm263_vm1, %v261_v38, 0.0 }
  0x8a   : > { %v269_v40 = vrot.slane %v264_v39, 7 }
  0x8c   : > { %v274_v41 = vsel %vm268_vm2, 0.0, %v269_v40 }
  0x8d   : > { %536 = vmatmul.msk.f32.vlgmr.msra.gmra.mxu1 %vm303_vm3, %v274_v41  ;;  %v298_v46 = vrot.slane %v274_v41, 1  ;;  %v369_v49 = vrot.slane %v274_v41, 2 }
  0x8f   : > { %v257_v42 = vpop.permute.xlu0 %256 }
  0x90   : > { %v262_v43 = vsel %vm260_vm0, 0.0, %v257_v42 }
  0x91   : > { %v265_v44 = vsel %vm263_vm1, %v262_v43, 0.0 }
  0x92   : > { %v270_v45 = vrot.slane %v265_v44, 7 }
  0x94   : > { %v275_v47 = vsel %vm268_vm2, %v270_v45, 0.0  ;;  %v271_v48 = vsel %vm268_vm2, %v269_v40, %v270_v45 }
  0x95   : > { %v301_v50 = vrot.slane %v275_v47, 1  ;;  %v299_v51 = vrot.slane %v271_v48, 1  ;;  %537 = vmatmul.msk.f32.gmra.mxu1 %vm303_vm3, %v271_v48  ;;  %v370_v52 = vrot.slane %v271_v48, 2  ;;  %v372_v56 = vrot.slane %v275_v47, 2 }
  0x97   : > { %v300_v53 = vsel %vm297_vm4, %v298_v46, %v299_v51  ;;  %v302_v54 = vsel %vm297_vm4, %v299_v51, %v301_v50  ;;  %v371_v55 = vsel %vm368_vm5, %v369_v49, %v370_v52  ;;  %v373_v57 = vsel %vm368_vm5, %v370_v52, %v372_v56 }
  0x98   : > { %534 = vmatmul.msk.f32.vlgmr.msra.gmra.mxu0 %vm303_vm3, %v300_v53  ;;  %535 = vmatmul.msk.f32.vlgmr.msra.gmra.mxu3 %vm303_vm3, %v302_v54 }
  0x99   : > { %547 = vmatmul.msk.f32.vlgmr.msra.gmra.mxu2 %vm303_vm3, %v371_v55 }
  0xa1   : > { %548 = vmatmul.msk.f32.gmra.mxu2 %vm303_vm3, %v373_v57 }
 0x10a   : > { %v352_v58 = vpop.f32.mrf.mxu1 }
 0x112   : > { %v355_v0 = vpop.f32.mrf.mxu1 }
 0x115   : > { %v325_v59 = vpop.f32.mrf.mxu0 }
 0x116   : > { %v353_v60 = vadd.f32 %v352_v58, %v325_v59 }
 0x11b   : > { %v328_v63 = vpop.f32.mrf.mxu3 }
 0x11c   : > { %v395_v61 = vpop.f32.mrf.mxu2  ;;  %v356_v1 = vadd.f32 %v355_v0, %v328_v63 }
 0x11d   : > { %v401_v62 = vadd.f32 %v395_v61, %v353_v60 }
 0x11f   : > { %404 = vst.msk [vmem:[%s231_s16] sm:$0xff] %vm403_vm6, %v401_v62  ;;  %v415_v3 = vmul.f32 %v401_v62, %v401_v62  ;;  %v406_v5 = vsel %vm403_vm6, %v401_v62, 0.0 }
 0x121   : > { %v417_v9 = vsel %vm403_vm6, %v415_v3, 0.0 }
 0x124   : > { %v398_v2 = vpop.f32.mrf.mxu2 }
 0x125   : > { %v402_v4 = vadd.f32 %v398_v2, %v356_v1 }
 0x127   : > { %405 = vst.msk [vmem:[%s231_s16 + $0x8] sm:$0xff] %vm403_vm6, %v402_v4  ;;  %v407_v6 = vsel %vm403_vm6, %v402_v4, 0.0  ;;  %v416_v7 = vmul.f32 %v402_v4, %v402_v4 }
 0x128   : > { %v408_v8 = vadd.f32 %v407_v6, %v406_v5 }
 0x129   : > { %v418_v10 = vsel %vm403_vm6, %v416_v7, 0.0 }
 0x12a   : > { %v409_v11 = vrot.slane %v408_v8, 4  ;;  %v419_v12 = vadd.f32 %v418_v10, %v417_v9 }
 0x12c   : > { %v410_v13 = vadd.f32 %v409_v11, %v408_v8  ;;  %v420_v14 = vrot.slane %v419_v12, 4 }
 0x12e   : > { %v411_v15 = vrot.slane %v410_v13, 2  ;;  %v421_v16 = vadd.f32 %v420_v14, %v419_v12 }
 0x130   : > { %v412_v17 = vadd.f32 %v411_v15, %v410_v13  ;;  %v422_v18 = vrot.slane %v421_v16, 2 }
 0x132   : > { %v413_v19 = vrot.slane %v412_v17, 1  ;;  %v423_v20 = vadd.f32 %v422_v18, %v421_v16 }
 0x134   : > { %v424_v21 = vrot.slane %v423_v20, 1  ;;  %v414_v22 = vadd.f32 %v413_v19, %v412_v17 }
 0x136   : > { %v425_v23 = vadd.f32 %v424_v21, %v423_v20 }
 0x138   : > { %v426_v24 = vsel %vm268_vm2, %v414_v22, %v425_v23 }
 0x139   : > { %428 = vst.msk [vmem:[%s235_s21] sm:$0x3] %vm427_vm7, %v426_v24 }
 0x13a PF: > { %s16_s18 = sadd.s32 1, %s579_s18  }
 0x13b   : > { %p13_p4 = scmp.ge.s32.totalorder %s16_s18, 4  }
 0x13d   :  { %15 = sbr.rel (!%p13_p4) target bundleno = 1 (0x1), region = 80 }

// kernel: residual_block.5
= control target key start
LH: loop header
LB: loop body
LE: loop exit
PB: predicated region body
PF: predicated region fallthrough
CT: control target
= control target key end

     0   :  { %s367_s15 = smov 0   ;;  %s393_s0 = inlined_call_operand.vmem [shape: f32[2,16,64], index: 0, kind: input, shape index: {}]   ;;  %s394_s1 = inlined_call_operand.vmem [shape: f32[2,16,64], index: 1, kind: input, shape index: {}]   ;;  %s395_s2 = inlined_call_operand.vmem [shape: f32[1,64], index: 2, kind: input, shape index: {}]   ;;  %s396_s3 = inlined_call_operand.vmem [shape: f32[1,64], index: 3, kind: input, shape index: {}]   ;;  %s397_s4 = inlined_call_operand.vmem [shape: f32[2,16,64], index: 4, kind: output, shape index: {}]  }
   0x1 LB: > { %s308_s16 = sadd.s32 4294967295, %s340_s15   ;;  %p312_p0 = scmp.ge.s32.totalorder %s340_s15, 1  ;;  %s340_s15 = sphi %s367_s15, %s14_s15  }
   0x2   : > { %p172_p1 = scmp.lt.s32.totalorder %s340_s15, 3 }
   0x4   : > { %p173_p2 = pnand %p312_p0, %p172_p1 }
   0x5   : > { %p203_p3 = scmp.lt.s32.totalorder (!%p173_p2), %s308_s16, 1 }
   0x6   : > { %176 = sbr.rel (%p173_p2) target bundleno = 25 (0x19), region = 36 }
   0xb   : > { %s399_s16 = smov (!%p203_p3, %s308_s16), 1  ;;  %v332_v0 = vld [vmem:[%s395_s2] ss:$0 sm:$0xff]  ;;  %vm238_vm0 = vcmask 523264  }
   0xc   : > { %s321_s19 = sshll.u32 %s399_s16, 4  ;;  %v333_v1 = vld [vmem:[%s396_s3] ss:$0 sm:$0xff] }
   0xd   : > { %s207_s22 = scalar_lea.vmem %s393_s0, %s321_s19  ;;  %s212_s25 = scalar_lea.vmem %s394_s1, %s321_s19 }
   0xe   : > { %v218_v2 = vld [vmem:[%s207_s22] sm:$0xff]  ;;  %v219_v3 = vld [vmem:[%s207_s22 + $0x8] sm:$0xff]  ;;  %s217_s30 = scalar_lea.vmem %s397_s4, %s321_s19 }
   0xf   : > { %v224_v4 = vmul.f32 %v332_v0, %v218_v2  ;;  %v225_v5 = vmul.f32 %v332_v0, %v219_v3  ;;  %v232_v6 = vld [vmem:[%s212_s25] sm:$0xff]  ;;  %v233_v7 = vld [vmem:[%s212_s25 + $0x8] sm:$0xff] }
  0x11   : > { %v230_v8 = vadd.f32 %v333_v1, %v224_v4  ;;  %v231_v9 = vadd.f32 %v333_v1, %v225_v5 }
  0x13   : > { %v234_v10 = vadd.f32 %v232_v6, %v230_v8  ;;  %v235_v11 = vadd.f32 %v233_v7, %v231_v9 }
  0x15   : > { %v236_v12 = vmax.f32 %v234_v10, 0.0  ;;  %v237_v13 = vmax.f32 %v235_v11, 0.0 }
  0x17   : > { %239 = vst.msk [vmem:[%s217_s30] sm:$0xff] %vm238_vm0, %v236_v12 }
  0x18   : > { %240 = vst.msk [vmem:[%s217_s30 + $0x8] sm:$0xff] %vm238_vm0, %v237_v13 }
  0x19 PF: > { %s14_s15 = sadd.s32 1, %s340_s15  }
  0x1a   : > { %p11_p4 = scmp.ge.s32.totalorder %s14_s15, 4  }
  0x1c   :  { %13 = sbr.rel (!%p11_p4) target bundleno = 1 (0x1), region = 69 }

</bundles_post_ra>
